<compile_context>
chip_gen: v6e
topology: v6e:2x2x1
jax: 0.10.0
libtpu: 0.0.40
codegen_flags: <defaults>
</compile_context>

<pallas_src>
import math

import jax
import jax.numpy as jnp
from jax.experimental import pallas as pl
from jax.experimental.pallas import tpu as pltpu


def _round_up(x: int, m: int) -> int:
    return ((x + m - 1) // m) * m


# --------------------------------------------------------------------------
# Kernel
# --------------------------------------------------------------------------
def noisynet_kernel(x_ref, w1_ref, wmu_ref, wsig_ref, packed_ref, o_ref):
    """Fused Linear -> ReLU -> NoisyLinear forward.

    x_ref      : (TB, Kp)        bf16
    w1_ref     : (Kp, Hp)        bf16
    wmu_ref    : (Hp, Ap)        bf16
    wsig_ref   : (Hp, Ap)        bf16   (= w_sigma * eps_in[:, None], pre-folded)
    packed_ref : (1, Hp + 3*Ap)  f32    = [ b1 | eps_out | b_mu | b_sigma ]
    o_ref      : (TB, Ap)        f32
    """
    Hp = w1_ref.shape[1]
    Ap = wmu_ref.shape[1]

    # Unpack the fused bias/noise-vector operand (static, lane-aligned slices).
    b1      = packed_ref[:, :Hp]                      # (1, Hp)
    eps_out = packed_ref[:, Hp:Hp + Ap]               # (1, Ap)
    b_mu    = packed_ref[:, Hp + Ap:Hp + 2 * Ap]      # (1, Ap)
    b_sigma = packed_ref[:, Hp + 2 * Ap:]             # (1, Ap)

    # Feature layer: bf16 operands on the MXU, f32 accumulation.
    h = jnp.dot(x_ref[...], w1_ref[...], preferred_element_type=jnp.float32)
    h = jnp.maximum(h + b1, 0.0)                      # (TB, Hp) f32

    # Noisy layer.  eps_in is already folded into wsig_ref, so the only noise
    # broadcast left is the lane-row (1, Ap) eps_out.  Combine in f32 on the
    # VPU (v5e-safe), cast to bf16 for the MXU.
    w_eff = (wmu_ref[...].astype(jnp.float32)
             + wsig_ref[...].astype(jnp.float32) * eps_out)       # (Hp, Ap)
    b_eff = b_mu + b_sigma * eps_out                              # (1, Ap)

    # NOTE: h is cast to bf16 for the second matmul (f32 accumulate); this adds
    # a small rounding error vs. a pure-f32 reference, covered by the tolerance.
    out = jnp.dot(h.astype(jnp.bfloat16), w_eff.astype(jnp.bfloat16),
                  preferred_element_type=jnp.float32) + b_eff
    o_ref[...] = out.astype(o_ref.dtype)


# --------------------------------------------------------------------------
# Parameter preparation (runs once at init / reset_noise, NOT per forward)
# --------------------------------------------------------------------------
def prepare_noisynet_params(w1, b1, w_mu, w_sigma, eps_in, eps_out, b_mu, b_sigma):
    """Pad/cast weights to MXU-native shapes and fold eps_in into w_sigma.

    Returns a dict of device arrays consumed directly by noisynet_forward.
    Call again whenever the noise (eps_in/eps_out) is reset.
    """
    K, H = w1.shape
    _, A = w_mu.shape
    # 128-multiples keep the v5e MXU full and outputs lane-dense; padding to
    # 256 would further help v6e/v7x at realistic H/A (micro-opt, skipped).
    Kp, Hp, Ap = _round_up(K, 128), _round_up(H, 128), _round_up(A, 128)

    f32, bf16 = jnp.float32, jnp.bfloat16

    def pad2(a, rows, cols, dtype):
        a = a.astype(dtype)
        return jnp.pad(a, ((0, rows - a.shape[0]), (0, cols - a.shape[1])))

    def pad1(a, n):
        return jnp.pad(a.astype(f32), (0, n - a.shape[0]))

    w1_p  = pad2(w1, Kp, Hp, bf16)
    wmu_p = pad2(w_mu, Hp, Ap, bf16)
    # Fold the column noise factor into sigma once per noise reset.
    wsig_eps_p = pad2(w_sigma.astype(f32) * eps_in[:, None].astype(f32),
                      Hp, Ap, bf16)
    packed = jnp.concatenate(
        [pad1(b1, Hp), pad1(eps_out, Ap), pad1(b_mu, Ap), pad1(b_sigma, Ap)]
    )[None, :]                                                    # (1, Hp+3*Ap) f32

    return {
        "w1": w1_p, "w_mu": wmu_p, "w_sigma_eps": wsig_eps_p, "packed": packed,
        "dims": (K, H, A), "padded": (Kp, Hp, Ap),
    }


def _vmem_estimate(block_b, Kp, Hp, Ap, weight_bufs):
    """Rough VMEM bytes: pipelined x/out, weights, packed vector, temporaries."""
    x_bytes = 2 * block_b * Kp * 2            # bf16, double-buffered
    o_bytes = 2 * block_b * Ap * 4            # f32, double-buffered
    w_bytes = weight_bufs * (Kp * Hp * 2 + 2 * Hp * Ap * 2)
    p_bytes = 2 * (Hp + 3 * Ap) * 4
    tmp_bytes = block_b * Hp * 4 + Hp * Ap * (4 + 2) + block_b * Ap * 4
    return x_bytes + o_bytes + w_bytes + p_bytes + tmp_bytes


# --------------------------------------------------------------------------
# Forward (hot path): only the activation is padded per call
# --------------------------------------------------------------------------
def noisynet_forward(x, params):
    """x: (B, K) f32  ->  (B, A) f32, training-mode NoisyNet forward."""
    K, H, A = params["dims"]
    Kp, Hp, Ap = params["padded"]
    B = x.shape[0]
    assert x.shape[1] == K

    # bf16 packs 16 sublanes per vreg -> round the batch block to 16; cap at
    # 512 (weights are grid-invariant, a (512, Kp) bf16 x tile is tiny).
    block_b = min(512, _round_up(max(B, 1), 16))
    Bp = _round_up(B, block_b)
    x_p = jnp.pad(x.astype(jnp.bfloat16), ((0, Bp - B), (0, Kp - K)))

    # Grid-invariant weight blocks never get re-fetched; drop to a single
    # buffer once they are big enough to matter for VMEM (v7x has 64 MiB).
    weight_bytes = (Kp * Hp + 2 * Hp * Ap) * 2
    single_buffer_weights = weight_bytes > (8 << 20)
    weight_bufs = 1 if single_buffer_weights else 2

    def weight_spec(rows, cols):
        if single_buffer_weights:
            return pl.BlockSpec((rows, cols), lambda i: (0, 0),
                                pipeline_mode=pl.Buffered(1))
        return pl.BlockSpec((rows, cols), lambda i: (0, 0))

    est = _vmem_estimate(block_b, Kp, Hp, Ap, weight_bufs)
    vmem_limit = int(min(max(2 * est, 16 << 20), 48 << 20))   # v7x-safe ceiling

    grid = (Bp // block_b,)
    out = pl.pallas_call(
        noisynet_kernel,
        out_shape=jax.ShapeDtypeStruct((Bp, Ap), jnp.float32),
        grid=grid,
        in_specs=[
            pl.BlockSpec((block_b, Kp), lambda i: (i, 0)),      # x tile per batch block
            weight_spec(Kp, Hp),                                # W1 (whole, grid-invariant)
            weight_spec(Hp, Ap),                                # w_mu
            weight_spec(Hp, Ap),                                # w_sigma * eps_in
            pl.BlockSpec((1, Hp + 3 * Ap), lambda i: (0, 0)),   # packed biases/noise
        ],
        out_specs=pl.BlockSpec((block_b, Ap), lambda i: (i, 0)),
        compiler_params=pltpu.CompilerParams(
            dimension_semantics=("parallel",),   # batch axis -> both TCs on v7x
            vmem_limit_bytes=vmem_limit,
        ),
    )(x_p, params["w1"], params["w_mu"], params["w_sigma_eps"], params["packed"])

    return out[:B, :A]


# --------------------------------------------------------------------------
# Init (mirrors nn.Linear + NoisyLinear.reset_parameters / reset_noise)
# --------------------------------------------------------------------------
def scale_noise(key, size):
    """Factorized gaussian noise: f(x) = sign(x) * sqrt(|x|)."""
    v = jax.random.normal(key, (size,), dtype=jnp.float32)
    return jnp.sign(v) * jnp.sqrt(jnp.abs(v))


def init_noisynet_params(key, obs_dim, hidden_dim, action_dim, std_init=0.5):
    k_feat_w, k_feat_b, k_wmu, k_bmu, k_eps_in, k_eps_out = jax.random.split(key, 6)

    # nn.Linear default init: U(-1/sqrt(fan_in), 1/sqrt(fan_in)).
    feat_bound = 1.0 / math.sqrt(obs_dim)
    w1 = jax.random.uniform(k_feat_w, (obs_dim, hidden_dim), jnp.float32,
                            -feat_bound, feat_bound).astype(jnp.bfloat16)  # (in, out)
    b1 = jax.random.uniform(k_feat_b, (hidden_dim,), jnp.float32,
                            -feat_bound, feat_bound)

    # NoisyLinear.reset_parameters()
    mu_range = 1.0 / math.sqrt(hidden_dim)
    w_mu = jax.random.uniform(k_wmu, (hidden_dim, action_dim), jnp.float32,
                              -mu_range, mu_range).astype(jnp.bfloat16)    # (in, out)
    w_sigma = jnp.full((hidden_dim, action_dim),
                       std_init / math.sqrt(hidden_dim), jnp.bfloat16)
    b_mu = jax.random.uniform(k_bmu, (action_dim,), jnp.float32,
                              -mu_range, mu_range)
    b_sigma = jnp.full((action_dim,), std_init / math.sqrt(action_dim), jnp.float32)

    # NoisyLinear.reset_noise(): factorized gaussian noise factors; the rank-1
    # structure is exploited (eps_in folded into sigma) at prepare time.
    eps_in = scale_noise(k_eps_in, hidden_dim)     # (H,)
    eps_out = scale_noise(k_eps_out, action_dim)   # (A,)

    return w1, b1, w_mu, w_sigma, eps_in, eps_out, b_mu, b_sigma


if __name__ == "__main__":
    # Small shapes implied by NoisyNet: state_shape=16, hidden_dim=32, action_shape=4.
    batch, obs_dim, hidden_dim, action_dim = 2, 16, 32, 4

    key = jax.random.PRNGKey(0)
    k_x, k_params = jax.random.split(key)

    x = jax.random.normal(k_x, (batch, obs_dim), dtype=jnp.float32)
    raw = init_noisynet_params(k_params, obs_dim, hidden_dim, action_dim)

    # One-time preparation (init / reset_noise time), NOT per forward.
    prepared = prepare_noisynet_params(*raw)

    out = noisynet_forward(x, prepared)
    out = jax.block_until_ready(out)

    # Pure-JAX reference (same bf16-stored weights, f32 math) for sanity.
    w1, b1, w_mu, w_sigma, eps_in, eps_out, b_mu, b_sigma = raw
    xr = x.astype(jnp.bfloat16).astype(jnp.float32)
    h_ref = jnp.maximum(xr @ w1.astype(jnp.float32) + b1[None, :], 0.0)
    w_eff = (w_mu.astype(jnp.float32)
             + w_sigma.astype(jnp.float32) * jnp.outer(eps_in, eps_out))
    b_eff = b_mu + b_sigma * eps_out
    out_ref = h_ref @ w_eff + b_eff[None, :]

    assert out.shape == (batch, action_dim)
    # bf16 MXU operands (f32 accumulate) -> loosened tolerance vs pure-f32 ref.
    assert jnp.allclose(out, out_ref, atol=2e-2, rtol=2e-2), (out, out_ref)

    print("KERNEL_OK")
</pallas_src>

<mosaic_0001>
module attributes {stable_mosaic.version = 11 : i64} {
  func.func @noisynet_kernel(%arg0: i32, %arg1: memref<16x128xbf16, #tpu.memory_space<vmem>>, %arg2: memref<128x128xbf16, #tpu.memory_space<vmem>>, %arg3: memref<128x128xbf16, #tpu.memory_space<vmem>>, %arg4: memref<128x128xbf16, #tpu.memory_space<vmem>>, %arg5: memref<1x512xf32, #tpu.memory_space<vmem>>, %arg6: memref<16x128xf32, #tpu.memory_space<vmem>>) attributes {dimension_semantics = [#tpu.dimension_semantics<parallel>], iteration_bounds = array<i64: 1>, scalar_prefetch = 0 : i64, scratch_operands = 0 : i64, tpu.core_type = #tpu.core_type<tc>, window_params = [{transform_indices = @transform_0, window_bounds = array<i64: 16, 128>}, {pipeline_mode = #tpu.pipeline_mode<synchronous>, transform_indices = @transform_1, window_bounds = array<i64: 128, 128>}, {pipeline_mode = #tpu.pipeline_mode<synchronous>, transform_indices = @transform_2, window_bounds = array<i64: 128, 128>}, {pipeline_mode = #tpu.pipeline_mode<synchronous>, transform_indices = @transform_3, window_bounds = array<i64: 128, 128>}, {pipeline_mode = #tpu.pipeline_mode<synchronous>, transform_indices = @transform_4, window_bounds = array<i64: 1, 512>}, {transform_indices = @transform_5, window_bounds = array<i64: 16, 128>}]} {
    %c0 = arith.constant 0 : index
    %c0_0 = arith.constant 0 : index
    %0 = vector.load %arg5[%c0, %c0_0] : memref<1x512xf32, #tpu.memory_space<vmem>>, vector<1x128xf32>
    %c0_1 = arith.constant 0 : index
    %c128 = arith.constant 128 : index
    %1 = vector.load %arg5[%c0_1, %c128] : memref<1x512xf32, #tpu.memory_space<vmem>>, vector<1x128xf32>
    %c0_2 = arith.constant 0 : index
    %c256 = arith.constant 256 : index
    %2 = vector.load %arg5[%c0_2, %c256] : memref<1x512xf32, #tpu.memory_space<vmem>>, vector<1x128xf32>
    %c0_3 = arith.constant 0 : index
    %c384 = arith.constant 384 : index
    %3 = vector.load %arg5[%c0_3, %c384] : memref<1x512xf32, #tpu.memory_space<vmem>>, vector<1x128xf32>
    %c0_4 = arith.constant 0 : index
    %c0_5 = arith.constant 0 : index
    %4 = vector.load %arg1[%c0_4, %c0_5] : memref<16x128xbf16, #tpu.memory_space<vmem>>, vector<16x128xbf16>
    %c0_6 = arith.constant 0 : index
    %c0_7 = arith.constant 0 : index
    %5 = vector.load %arg2[%c0_6, %c0_7] : memref<128x128xbf16, #tpu.memory_space<vmem>>, vector<128x128xbf16>
    %cst = arith.constant dense<0.000000e+00> : vector<16x128xf32>
    %6 = tpu.matmul %4, %5, %cst {dimension_numbers = #tpu.dot_dimension_numbers<[1], [0], [0], [1], [0, 0, 1, 1], [], []>} : vector<16x128xbf16>, vector<128x128xbf16>, vector<16x128xf32> -> vector<16x128xf32>
    %7 = vector.broadcast %0 : vector<1x128xf32> to vector<16x128xf32>
    %8 = arith.addf %6, %7 : vector<16x128xf32>
    %cst_8 = arith.constant 0.000000e+00 : f32
    %9 = vector.broadcast %cst_8 : f32 to vector<16x128xf32>
    %10 = arith.maximumf %8, %9 : vector<16x128xf32>
    %c0_9 = arith.constant 0 : index
    %c0_10 = arith.constant 0 : index
    %11 = vector.load %arg3[%c0_9, %c0_10] : memref<128x128xbf16, #tpu.memory_space<vmem>>, vector<128x128xbf16>
    %12 = arith.extf %11 : vector<128x128xbf16> to vector<128x128xf32>
    %c0_11 = arith.constant 0 : index
    %c0_12 = arith.constant 0 : index
    %13 = vector.load %arg4[%c0_11, %c0_12] : memref<128x128xbf16, #tpu.memory_space<vmem>>, vector<128x128xbf16>
    %14 = arith.extf %13 : vector<128x128xbf16> to vector<128x128xf32>
    %15 = vector.broadcast %1 : vector<1x128xf32> to vector<128x128xf32>
    %16 = arith.mulf %14, %15 : vector<128x128xf32>
    %17 = arith.addf %12, %16 : vector<128x128xf32>
    %18 = arith.mulf %3, %1 : vector<1x128xf32>
    %19 = arith.addf %2, %18 : vector<1x128xf32>
    %20 = arith.truncf %10 : vector<16x128xf32> to vector<16x128xbf16>
    %21 = arith.truncf %17 : vector<128x128xf32> to vector<128x128xbf16>
    %cst_13 = arith.constant dense<0.000000e+00> : vector<16x128xf32>
    %22 = tpu.matmul %20, %21, %cst_13 {dimension_numbers = #tpu.dot_dimension_numbers<[1], [0], [0], [1], [0, 0, 1, 1], [], []>} : vector<16x128xbf16>, vector<128x128xbf16>, vector<16x128xf32> -> vector<16x128xf32>
    %23 = vector.broadcast %19 : vector<1x128xf32> to vector<16x128xf32>
    %24 = arith.addf %22, %23 : vector<16x128xf32>
    %c0_14 = arith.constant 0 : index
    %c0_15 = arith.constant 0 : index
    %25 = vector.load %arg6[%c0_14, %c0_15] : memref<16x128xf32, #tpu.memory_space<vmem>>, vector<16x128xf32>
    tpu.vector_store %arg6[%c0_14, %c0_15], %24 {strides = array<i32>} : memref<16x128xf32, #tpu.memory_space<vmem>>, vector<16x128xf32>,
    return
  }
  func.func @transform_0(%arg0: i32) -> (i32, i32) {
    %c0_i32 = arith.constant 0 : i32
    %c0_i32_0 = arith.constant 0 : i32
    return %arg0, %c0_i32 : i32, i32
  }
  func.func @transform_1(%arg0: i32) -> (i32, i32) {
    %c0_i32 = arith.constant 0 : i32
    %c0_i32_0 = arith.constant 0 : i32
    %c0_i32_1 = arith.constant 0 : i32
    return %c0_i32, %c0_i32_0 : i32, i32
  }
  func.func @transform_2(%arg0: i32) -> (i32, i32) {
    %c0_i32 = arith.constant 0 : i32
    %c0_i32_0 = arith.constant 0 : i32
    %c0_i32_1 = arith.constant 0 : i32
    return %c0_i32, %c0_i32_0 : i32, i32
  }
  func.func @transform_3(%arg0: i32) -> (i32, i32) {
    %c0_i32 = arith.constant 0 : i32
    %c0_i32_0 = arith.constant 0 : i32
    %c0_i32_1 = arith.constant 0 : i32
    return %c0_i32, %c0_i32_0 : i32, i32
  }
  func.func @transform_4(%arg0: i32) -> (i32, i32) {
    %c0_i32 = arith.constant 0 : i32
    %c0_i32_0 = arith.constant 0 : i32
    %c0_i32_1 = arith.constant 0 : i32
    return %c0_i32, %c0_i32_0 : i32, i32
  }
  func.func @transform_5(%arg0: i32) -> (i32, i32) {
    %c0_i32 = arith.constant 0 : i32
    %c0_i32_0 = arith.constant 0 : i32
    return %arg0, %c0_i32 : i32, i32
  }
}

</mosaic_0001>

<bundles_post_ra>
// kernel: tpu_custom_call.1
= control target key start
LH: loop header
LB: loop body
LE: loop exit
PB: predicated region body
PF: predicated region fallthrough
CT: control target
= control target key end

     0   :  { %10 = vsyncpa [#allocation3], 0  ;;  %s784_s0 = inlined_call_operand.hbm [shape: bf16[16,128], index: 0, kind: input, shape index: {}]   ;;  %s785_s1 = inlined_call_operand.hbm [shape: bf16[128,128], index: 1, kind: input, shape index: {}]   ;;  %s786_s2 = inlined_call_operand.hbm [shape: bf16[128,128], index: 2, kind: input, shape index: {}]   ;;  %s787_s3 = inlined_call_operand.hbm [shape: bf16[128,128], index: 3, kind: input, shape index: {}]   ;;  %s788_s4 = inlined_call_operand.vmem [shape: f32[1,512], index: 4, kind: input, shape index: {}]   ;;  %s789_s5 = inlined_call_operand.hbm [shape: f32[16,128], index: 5, kind: output, shape index: {}]  }
   0x1   :  { %11 = vsyncpa [#allocation6], 0 }
   0x2   :  { %12 = vsyncpa [#allocation9], 0 }
   0x3   :  { %13 = vsyncpa [#allocation4], 0  ;;  %s657_s18 = smov [#allocation5]   ;;  %s658_s20 = smov [#allocation2]  }
   0x4   :  { %s31_s19 = sshll.u32 %s657_s18, 4  ;;  %s19_s21 = sshll.u32 %s658_s20, 4  ;;  %s32_s19 = int_to_ptr.vmem [resolvable:$true] %s31_s19  ;;  %s20_s21 = int_to_ptr.vmem [resolvable:$true] %s19_s21 }
   0x5   :  { %s557_s22 = scalar_lea.vmem %s32_s19, 1024  ;;  %p562_p1 = scmp.lt.s32.totalorder %s32_s19, %s32_s19 }
   0x6   :  { %p558_p0 = scmp.ne.s32.totalorder %s32_s19, %s557_s22  ;;  %p563_p2 = scmp.lt.s32.totalorder %s557_s22, %s557_s22 }
   0x8   :  { %p564_p3 = por %p563_p2, %p562_p1 }
   0xa   :  { %p565_p4 = pnand %p564_p3, %p558_p0 }
   0xc   :  { %568 = shalt.err (!%p565_p4)
}
   0xd   :  { %s659_s23 = smov 64   ;;  %s660_s24 = smov 4  }
   0xe   :  { %37 = dma.hbm_to_vmem [thread:$0]  %s785_s1, 1024, %s32_s19, [#allocation6], %s659_s23, %s659_s23, %s660_s24  }
   0xf   :  { %s577_s27 = scalar_lea.vmem %s20_s21, 128  ;;  %p582_p6 = scmp.lt.s32.totalorder %s20_s21, %s20_s21 }
  0x10   :  { %p578_p5 = scmp.ne.s32.totalorder %s20_s21, %s577_s27  ;;  %p583_p7 = scmp.lt.s32.totalorder %s577_s27, %s577_s27 }
  0x12   :  { %p584_p8 = por %p583_p7, %p582_p6 }
  0x14   :  { %p585_p9 = pnand %p584_p8, %p578_p5 }
  0x16   :  { %588 = shalt.err (!%p585_p9)
}
  0x17   :  { %25 = dma.hbm_to_vmem [thread:$0]  %s784_s0, 128, %s20_s21, [#allocation3], %s659_s23, %s659_s23, %s660_s24  }
  0x18   :  { %s661_s30 = smov [#allocation7]   ;;  %s662_s7 = smov [#allocation8]  }
  0x19   :  { %s43_s6 = sshll.u32 %s661_s30, 4  ;;  %s55_s8 = sshll.u32 %s662_s7, 4  ;;  %s44_s6 = int_to_ptr.vmem [resolvable:$true] %s43_s6  ;;  %s56_s8 = int_to_ptr.vmem [resolvable:$true] %s55_s8 }
  0x1a   :  { %s597_s1 = scalar_lea.vmem %s44_s6, 1024  ;;  %p602_p11 = scmp.lt.s32.totalorder %s44_s6, %s44_s6 }
  0x1b   :  { %p598_p10 = scmp.ne.s32.totalorder %s44_s6, %s597_s1  ;;  %p603_p12 = scmp.lt.s32.totalorder %s597_s1, %s597_s1 }
  0x1d   :  { %p604_p13 = por %p603_p12, %p602_p11 }
  0x1f   :  { %p605_p0 = pnand %p604_p13, %p598_p10 }
  0x21   :  { %608 = shalt.err (!%p605_p0)
}
  0x22   :  { %49 = dma.hbm_to_vmem [thread:$0]  %s786_s2, 1024, %s44_s6, [#allocation6], %s659_s23, %s659_s23, %s660_s24  }
  0x23   :  { %s617_s0 = scalar_lea.vmem %s56_s8, 1024  ;;  %p622_p2 = scmp.lt.s32.totalorder %s56_s8, %s56_s8 }
  0x24   :  { %p618_p1 = scmp.ne.s32.totalorder %s56_s8, %s617_s0  ;;  %p623_p3 = scmp.lt.s32.totalorder %s617_s0, %s617_s0 }
  0x26   :  { %p624_p4 = por %p623_p3, %p622_p2 }
  0x28   :  { %p625_p5 = pnand %p624_p4, %p618_p1 }
  0x2a   :  { %628 = shalt.err (!%p625_p5)
}
  0x2b   :  { %61 = dma.hbm_to_vmem [thread:$0]  %s787_s3, 1024, %s56_s8, [#allocation9], %s659_s23, %s659_s23, %s660_s24  }
  0x2c   :  { %649 = dma.done.wait [#allocation3], 128  }
  0x2d   :  { %650 = vsyncadd [#allocation3], 4294967168 }
  0x2e   :  { %651 = dma.done.wait [#allocation6], 2048  }
  0x2f   :  { %652 = vsyncadd [#allocation6], 4294965248 }
  0x30   :  { %653 = dma.done.wait [#allocation9], 1024  }
  0x31   :  { %654 = vsyncadd [#allocation9], 4294966272  ;;  %v663_v0 = vmov 0.0   ;;  %vm664_vm0 = vmmov 0   ;;  %v267_v1 = vlaneseq  ;;  %v540_v2 = vld [vmem:[#allocation5 + $0x38] sm:$0xff]   ;;  %v541_v3 = vld [vmem:[#allocation5 + $0x30] sm:$0xff]  }
  0x32   :  { %489 = vmatprep.subr.bf16.mxu0 %v663_v0  ;;  %505 = vmatprep.mubr.msk.bf16.mxu0 %vm664_vm0, %v663_v0  ;;  %v542_v5 = vld [vmem:[#allocation5 + $0x28] sm:$0xff]   ;;  %v734_v7 = vld [vmem:[%s788_s4 + $0x1] sm:$0x1]  ;;  %v543_v10 = vld [vmem:[#allocation5 + $0x20] sm:$0xff]   ;;  %s665_s19 = smov [#allocation10]  }
  0x33   :  { %509 = vmatprep.subr.bf16.mxu1 %v663_v0  ;;  %525 = vmatprep.mubr.msk.bf16.mxu1 %vm664_vm0, %v663_v0  ;;  %v727_v4 = vshrl.u32 %v267_v1, 7  ;;  %v463_v8 = vld [vmem:[#allocation7 + $0x38] sm:$0xff]   ;;  %v462_v14 = vld [vmem:[#allocation7 + $0x30] sm:$0xff]   ;;  %v461_v20 = vld [vmem:[#allocation7 + $0x28] sm:$0xff]   ;;  %s369_s20 = sshll.u32 %s665_s19, 4  ;;  %s370_s20 = int_to_ptr.vmem [resolvable:$true] %s369_s20 }
  0x34   :  { %490 = vmatpush3.bf16.msra.mxu0 %v540_v2  ;;  %v470_v9 = vld [vmem:[#allocation8 + $0x38] sm:$0xff]   ;;  %v423_v11 = vunpack.c.l.bf16 %v463_v8  ;;  %v469_v15 = vld [vmem:[#allocation8 + $0x30] sm:$0xff]   ;;  %v424_v16 = vunpack.c.h.bf16 %v463_v8  ;;  %v419_v18 = vunpack.c.l.bf16 %v462_v14  ;;  %v468_v21 = vld [vmem:[#allocation8 + $0x28] sm:$0xff]   ;;  %v420_v22 = vunpack.c.h.bf16 %v462_v14  ;;  %s629_s21 = scalar_lea.vmem %s370_s20, 256  ;;  %p634_p7 = scmp.lt.s32.totalorder %s370_s20, %s370_s20 }
  0x35   :  { %491 = vmatprep.subr.bf16.mxu0 %v663_v0  ;;  %v269_v6 = vsub.s32 0, %v727_v4  ;;  %v455_v12 = vunpack.c.l.bf16 %v470_v9  ;;  %v456_v13 = vunpack.c.h.bf16 %v470_v9  ;;  %v451_v19 = vunpack.c.l.bf16 %v469_v15  ;;  %v467_v29 = vld [vmem:[#allocation8 + $0x20] sm:$0xff]   ;;  %v544_v30 = vld [vmem:[#allocation5 + $0x18] sm:$0xff]   ;;  %v545_v46 = vld [vmem:[#allocation5 + $0x10] sm:$0xff]   ;;  %p630_p6 = scmp.ne.s32.totalorder %s370_s20, %s629_s21  ;;  %p635_p8 = scmp.lt.s32.totalorder %s629_s21, %s629_s21 }
  0x36   :  { %v452_v23 = vunpack.c.h.bf16 %v469_v15  ;;  %v447_v24 = vunpack.c.l.bf16 %v468_v21  ;;  %v448_v28 = vunpack.c.h.bf16 %v468_v21  ;;  %v415_v32 = vunpack.c.l.bf16 %v461_v20  ;;  %v460_v35 = vld [vmem:[#allocation7 + $0x20] sm:$0xff]   ;;  %v466_v43 = vld [vmem:[#allocation8 + $0x18] sm:$0xff]   ;;  %v546_v56 = vld [vmem:[#allocation5 + $0x8] sm:$0xff]  }
  0x37   :  { %v740_v17 = vrot.slane %v734_v7, %v269_v6  ;;  %v416_v33 = vunpack.c.h.bf16 %v461_v20  ;;  %v443_v41 = vunpack.c.l.bf16 %v467_v29  ;;  %v444_v42 = vunpack.c.h.bf16 %v467_v29  ;;  %v459_v53 = vld [vmem:[#allocation7 + $0x18] sm:$0xff]   ;;  %v547_v1 = vld [vmem:[#allocation5] sm:$0xff]   ;;  %p636_p9 = por %p635_p8, %p634_p7 }
  0x38   :  { %492 = vmatpush3.bf16.msra.mxu0 %v541_v3  ;;  %v411_v45 = vunpack.c.l.bf16 %v460_v35  ;;  %v412_v49 = vunpack.c.h.bf16 %v460_v35  ;;  %v439_v54 = vunpack.c.l.bf16 %v466_v43  ;;  %v440_v55 = vunpack.c.h.bf16 %v466_v43  ;;  %v548_v8 = vld [vmem:[#allocation2] sm:$0xff]   ;;  %v394_v35 = vld [vmem:[#allocation7] sm:$0xff]  }
  0x39   :  { %493 = vmatprep.subr.bf16.mxu0 %v663_v0  ;;  %v286_v25 = vmul.f32 %v455_v12, %v740_v17  ;;  %v287_v26 = vmul.f32 %v456_v13, %v740_v17  ;;  %v284_v27 = vmul.f32 %v451_v19, %v740_v17  ;;  %v285_v31 = vmul.f32 %v452_v23, %v740_v17  ;;  %v458_v13 = vld [vmem:[#allocation7 + $0x10] sm:$0xff]   ;;  %v464_v19 = vld [vmem:[#allocation8 + $0x8] sm:$0xff]   ;;  %p637_p10 = pnand %p636_p9, %p630_p6 }
  0x3a   :  { %v282_v34 = vmul.f32 %v447_v24, %v740_v17  ;;  %v283_v39 = vmul.f32 %v448_v28, %v740_v17  ;;  %v280_v50 = vmul.f32 %v443_v41, %v740_v17  ;;  %v281_v52 = vmul.f32 %v444_v42, %v740_v17  ;;  %v457_v24 = vld [vmem:[#allocation7 + $0x8] sm:$0xff]  }
  0x3b   :  { %v302_v36 = vadd.f32 %v423_v11, %v286_v25  ;;  %v303_v37 = vadd.f32 %v424_v16, %v287_v26  ;;  %v300_v38 = vadd.f32 %v419_v18, %v284_v27  ;;  %v301_v40 = vadd.f32 %v420_v22, %v285_v31 }
  0x3c   :  { %494 = vmatpush3.bf16.msra.mxu0 %v542_v5  ;;  %v298_v47 = vadd.f32 %v415_v32, %v282_v34  ;;  %v299_v48 = vadd.f32 %v416_v33, %v283_v39  ;;  %v296_v58 = vadd.f32 %v411_v45, %v280_v50  ;;  %v407_v59 = vunpack.c.l.bf16 %v459_v53 }
  0x3d   :  { %495 = vmatprep.subr.bf16.mxu0 %v663_v0  ;;  %v314_v44 = vpack.c.bf16 %v303_v37, %v302_v36  ;;  %v313_v51 = vpack.c.bf16 %v301_v40, %v300_v38  ;;  %v297_v60 = vadd.f32 %v412_v49, %v281_v52  ;;  %v408_v61 = vunpack.c.h.bf16 %v459_v53 }
  0x3e   :  { %v312_v57 = vpack.c.bf16 %v299_v48, %v298_v47  ;;  %v278_v62 = vmul.f32 %v439_v54, %v740_v17  ;;  %v279_v63 = vmul.f32 %v440_v55, %v740_v17  ;;  %v403_v14 = vunpack.c.l.bf16 %v458_v13  ;;  %v79_v54 = vld [vmem:[%s788_s4 + $0x2] sm:$0x1] }
  0x3f   :  { %510 = vmatpush3.bf16.msra.mxu1 %v314_v44  ;;  %v311_v2 = vpack.c.bf16 %v297_v60, %v296_v58  ;;  %v404_v15 = vunpack.c.h.bf16 %v458_v13  ;;  %v431_v22 = vunpack.c.l.bf16 %v464_v19  ;;  %v432_v23 = vunpack.c.h.bf16 %v464_v19  ;;  %v383_v44 = vld [vmem:[%s788_s4] ss:$0 sm:$0xff] }
  0x40   :  { %496 = vmatpush3.bf16.msra.mxu0 %v543_v10  ;;  %511 = vmatprep.subr.bf16.mxu1 %v663_v0  ;;  %v294_v3 = vadd.f32 %v407_v59, %v278_v62  ;;  %v295_v5 = vadd.f32 %v408_v61, %v279_v63  ;;  %v465_v10 = vld [vmem:[#allocation8 + $0x10] sm:$0xff]   ;;  %v399_v26 = vunpack.c.l.bf16 %v457_v24  ;;  %v400_v27 = vunpack.c.h.bf16 %v457_v24 }
  0x41   :  { %497 = vmatprep.subr.bf16.mxu0 %v663_v0  ;;  %v435_v11 = vunpack.c.l.bf16 %v465_v10  ;;  %v436_v12 = vunpack.c.h.bf16 %v465_v10  ;;  %v274_v28 = vmul.f32 %v431_v22, %v740_v17  ;;  %v275_v29 = vmul.f32 %v432_v23, %v740_v17 }
  0x42   :  { %v310_v9 = vpack.c.bf16 %v295_v5, %v294_v3  ;;  %v395_v36 = vunpack.c.l.bf16 %v394_v35  ;;  %v396_v37 = vunpack.c.h.bf16 %v394_v35 }
  0x43   :  { %512 = vmatpush3.bf16.msra.mxu1 %v313_v51  ;;  %v276_v16 = vmul.f32 %v435_v11, %v740_v17  ;;  %v277_v18 = vmul.f32 %v436_v12, %v740_v17  ;;  %v290_v31 = vadd.f32 %v399_v26, %v274_v28  ;;  %v291_v34 = vadd.f32 %v400_v27, %v275_v29 }
  0x44   :  { %498 = vmatpush3.bf16.msra.mxu0 %v544_v30  ;;  %513 = vmatprep.subr.bf16.mxu1 %v663_v0  ;;  %v426_v30 = vld [vmem:[#allocation8] sm:$0xff]  }
  0x45   :  { %499 = vmatprep.subr.bf16.mxu0 %v663_v0  ;;  %v292_v20 = vadd.f32 %v403_v14, %v276_v16  ;;  %v293_v21 = vadd.f32 %v404_v15, %v277_v18  ;;  %v427_v32 = vunpack.c.l.bf16 %v426_v30  ;;  %v428_v33 = vunpack.c.h.bf16 %v426_v30 }
  0x46   :  { %v308_v40 = vpack.c.bf16 %v291_v34, %v290_v31 }
  0x47   :  { %514 = vmatpush3.bf16.msra.mxu1 %v312_v57  ;;  %v309_v25 = vpack.c.bf16 %v293_v21, %v292_v20  ;;  %v272_v38 = vmul.f32 %v427_v32, %v740_v17  ;;  %v273_v39 = vmul.f32 %v428_v33, %v740_v17 }
  0x48   :  { %500 = vmatpush3.bf16.msra.mxu0 %v545_v46  ;;  %515 = vmatprep.subr.bf16.mxu1 %v663_v0 }
  0x49   :  { %501 = vmatprep.subr.bf16.mxu0 %v663_v0  ;;  %v288_v41 = vadd.f32 %v395_v36, %v272_v38  ;;  %v289_v42 = vadd.f32 %v396_v37, %v273_v39 }
  0x4b   :  { %516 = vmatpush3.bf16.msra.mxu1 %v311_v2  ;;  %v307_v43 = vpack.c.bf16 %v289_v42, %v288_v41 }
  0x4c   :  { %502 = vmatpush3.bf16.msra.mxu0 %v546_v56  ;;  %517 = vmatprep.subr.bf16.mxu1 %v663_v0 }
  0x4d   :  { %503 = vmatprep.subr.bf16.mxu0 %v663_v0 }
  0x4f   :  { %518 = vmatpush3.bf16.msra.mxu1 %v310_v9 }
  0x50   :  { %504 = vmatpush3.bf16.msra.mxu0 %v547_v1  ;;  %519 = vmatprep.subr.bf16.mxu1 %v663_v0 }
  0x53   :  { %506 = vmatmul.mubr.bf16.vlgmr.msra.gmra.mxu0 %v548_v8  ;;  %520 = vmatpush3.bf16.msra.mxu1 %v309_v25 }
  0x54   :  { %521 = vmatprep.subr.bf16.mxu1 %v663_v0 }
  0x57   :  { %522 = vmatpush3.bf16.msra.mxu1 %v308_v40 }
  0x58   :  { %523 = vmatprep.subr.bf16.mxu1 %v663_v0  ;;  %v80_v0 = vld [vmem:[%s788_s4 + $0x3] sm:$0x1] }
  0x59   :  { %v304_v53 = vmul.f32 %v80_v0, %v734_v7 }
  0x5b   :  { %524 = vmatpush3.bf16.msra.mxu1 %v307_v43  ;;  %v305_v55 = vadd.f32 %v304_v53, %v79_v54 }
  0x5d   :  { %v319_v56 = vrot.slane %v305_v55, %v269_v6 }
 0x113   :  { %v193_v45 = vpop.f32.mrf.mxu0 }
 0x114   :  { %v194_v47 = vadd.f32 %v383_v44, %v193_v45 }
 0x115   :  { %v507_v46 = vpop.f32.mrf.mxu0 }
 0x116   :  { %v200_v51 = vmax.f32 %v194_v47, 0.0 }
 0x117   :  { %v196_v48 = vpop.f32.mrf.mxu0 }
 0x118   :  { %v197_v49 = vadd.f32 %v383_v44, %v196_v48 }
 0x119   :  { %v508_v50 = vpop.f32.mrf.mxu0 }
 0x11a   :  { %v201_v17 = vmax.f32 %v197_v49, 0.0 }
 0x11c   :  { %v306_v52 = vpack.c.bf16 %v201_v17, %v200_v51 }
 0x11e   :  { %526 = vmatmul.mubr.bf16.vlgmr.msra.gmra.mxu1 %v306_v52 }
 0x1de   :  { %v355_v57 = vpop.f32.mrf.mxu1 }
 0x1df   :  { %v356_v58 = vadd.f32 %v355_v57, %v319_v56 }
 0x1e0   :  { %v527_v59 = vpop.f32.mrf.mxu1 }
 0x1e1   :  { %362 = vst [vmem:[#allocation10] sm:$0xff] %v356_v58 }
 0x1e2   :  { %v358_v60 = vpop.f32.mrf.mxu1 }
 0x1e3   :  { %v359_v61 = vadd.f32 %v358_v60, %v319_v56 }
 0x1e4   :  { %v528_v62 = vpop.f32.mrf.mxu1 }
 0x1e5   :  { %363 = vst [vmem:[#allocation10 + $0x8] sm:$0xff] %v359_v61 }
 0x1e6   :  { %640 = shalt.err (!%p637_p10)
}
 0x1e7   :  { %s666_s4 = smov 128   ;;  %s667_s22 = smov 8  }
 0x1e8   :  { %375 = dma.vmem_to_hbm [thread:$0]  %s370_s20, 256, %s789_s5, [#allocation4], %s666_s4, %s666_s4, %s667_s22  }
 0x1e9   :  { %655 = dma.done.wait [#allocation4], 256  }
 0x1ea   :  { %656 = vsyncadd [#allocation4], 4294967040 }
 0x1eb   :  { %379 = vsyncpa [#allocation3], 1 }
 0x1ec   :  { %380 = vsyncpa [#allocation6], 1 }
 0x1ed   :  { %381 = vsyncpa [#allocation9], 1 }
 0x1ee   :  { %382 = vsyncpa [#allocation4], 1 }

</bundles_post_ra>
